<compile_context>
chip_gen: v5e
topology: v5e:2x2
jax: 0.10.0
libtpu: 0.0.40
codegen_flags: <defaults>
</compile_context>

<pallas_src>
import jax
import jax.numpy as jnp
from jax import lax
from jax.experimental import pallas as pl
from jax.experimental.pallas import tpu as pltpu

_LANE = 128
_MAX_SINGLE_TILE = 1024   # up to this batch: one whole-batch tile, no grid
_MAX_TILE = 2048          # batch-tile cap for the tiled (grid) path


def _cdiv(a, b):
    return -(-a // b)


def _round_up(x, m):
    return _cdiv(x, m) * m


def _choose_tile(batch):
    """Return (tile_b, num_tiles).

    Small batches: a single whole-batch tile (grid-free path).
    Large batches: multiple-of-8 tiles capped at _MAX_TILE, with an even tile
    count so both of v7x's TensorCores get work.
    """
    if batch <= _MAX_SINGLE_TILE:
        return batch, 1
    n = _cdiv(batch, _MAX_TILE)
    if n % 2:
        n += 1                                  # even grid -> 2-TC sharding on v7x
    tile = _round_up(_cdiv(batch, n), 8)        # sublane-aligned tile
    return tile, _cdiv(batch, tile)


def _vmem_limit_bytes(tile_b, h1p, h2p):
    """Explicit VMEM budget for the chosen tile, with headroom, clamped to a
    limit that is safe on every generation (v5e 16 MiB scoped default, v7x
    64 MiB physical / 32 MiB scoped default)."""
    lane_row = _LANE * 4                               # one padded f32 row
    act = 2 * 2 * tile_b * lane_row                    # state+action tiles, double-buffered
    hid = 2 * tile_b * max(h1p, h2p) * 4               # h1 / h2 f32 temporaries
    wgt = 2 * 4 * (h1p * h2p + 4 * max(h1p, h2p))      # weights/biases (generous)
    out = 2 * _round_up(tile_b, _LANE) * 4             # lane-dense q row
    budget = act + hid + wgt + out
    return int(min(max(2 * budget, 16 * 2 ** 20), 32 * 2 ** 20))


def _mlp_q_kernel(state_ref, action_ref, w1s_ref, w1a_ref, b1_ref,
                  w2_ref, b2_ref, w3_ref, b3_ref, o_ref):
    # ---- hidden layer 1: split matmul (no concat) + bias + ReLU -------------
    h1 = (
        jnp.dot(state_ref[...], w1s_ref[...], preferred_element_type=jnp.float32)
        + jnp.dot(action_ref[...], w1a_ref[...], preferred_element_type=jnp.float32)
        + b1_ref[...]
    )
    h1 = jnp.maximum(h1, 0.0)

    # ---- hidden layer 2: Linear + ReLU --------------------------------------
    h2 = jnp.dot(h1, w2_ref[...], preferred_element_type=jnp.float32) + b2_ref[...]
    h2 = jnp.maximum(h2, 0.0)

    # ---- output layer (N=1), LANE-DENSE: (1,H2P) x (Tb,H2P) contracted over
    # H2P -> (1, Tb) row; stored as one unmasked lane-dense row (no XLU reduce,
    # no masked 1-lane column stores). b3 is a scalar read from SMEM.
    q_row = lax.dot_general(
        w3_ref[...], h2,
        dimension_numbers=(((1,), (1,)), ((), ())),
        preferred_element_type=jnp.float32,
    ) + b3_ref[0, 0]
    o_ref[...] = q_row.astype(o_ref.dtype)


@jax.jit
def critic_q_forward(state, action, params):
    """Forward pass of CriticQ_mlp: q = MLP(concat(state, action)) -> (B, 1)."""
    w1s, w1a, b1, w2, b2, w3, b3 = params
    batch, n_states = state.shape
    n_actions = action.shape[1]
    h1p = w1s.shape[1]
    h2p = w2.shape[1]

    tile_b, num_tiles = _choose_tile(batch)
    vmem_limit = _vmem_limit_bytes(tile_b, h1p, h2p)

    flops = 2 * batch * ((n_states + n_actions) * h1p + h1p * h2p + h2p)
    bytes_accessed = 4 * (
        batch * (n_states + n_actions + 1)
        + (n_states + n_actions) * h1p + h1p * h2p + h1p + 2 * h2p + 1
    )
    cost = pl.CostEstimate(flops=flops, transcendentals=0,
                           bytes_accessed=bytes_accessed)

    if num_tiles == 1:
        # Small-batch fast path: no grid, no 1-step pipeline; whole arrays in
        # VMEM, scalar bias in SMEM.  Output is a lane-dense (1, B) row.
        vmem = pl.BlockSpec(memory_space=pltpu.MemorySpace.VMEM)
        out = pl.pallas_call(
            _mlp_q_kernel,
            out_shape=jax.ShapeDtypeStruct((1, batch), jnp.float32),
            in_specs=[vmem] * 8
                     + [pl.BlockSpec(memory_space=pltpu.MemorySpace.SMEM)],
            out_specs=vmem,
            cost_estimate=cost,
            compiler_params=pltpu.CompilerParams(vmem_limit_bytes=vmem_limit),
        )(state, action, w1s, w1a, b1, w2, b2, w3, b3)
        # (1, B) -> (B, 1): contiguous reshape, not a transpose.
        return out.reshape(batch, 1)

    # Tiled path: batch split into sublane-aligned tiles, cdiv grid handles a
    # partial last tile; weights/biases are grid-invariant blocks (fetched
    # once); output is a lane-dense (1, tile_b) row per tile.
    inv = lambda shape: pl.BlockSpec(shape, lambda i: (0, 0))
    out = pl.pallas_call(
        _mlp_q_kernel,
        out_shape=jax.ShapeDtypeStruct((num_tiles, 1, tile_b), jnp.float32),
        grid=(num_tiles,),
        in_specs=[
            pl.BlockSpec((tile_b, n_states), lambda i: (i, 0)),   # state tile
            pl.BlockSpec((tile_b, n_actions), lambda i: (i, 0)),  # action tile
            inv((n_states, h1p)),                                 # w1_s
            inv((n_actions, h1p)),                                # w1_a
            inv((1, h1p)),                                        # b1
            inv((h1p, h2p)),                                      # w2
            inv((1, h2p)),                                        # b2
            inv((1, h2p)),                                        # w3 row
            pl.BlockSpec(memory_space=pltpu.MemorySpace.SMEM),    # b3 scalar
        ],
        # Leading grid dim squeezed: kernel sees a lane-dense (1, tile_b) row.
        out_specs=pl.BlockSpec((None, 1, tile_b), lambda i: (i, 0, 0)),
        cost_estimate=cost,
        compiler_params=pltpu.CompilerParams(
            dimension_semantics=("parallel",),   # shard tiles across v7x's 2 TCs
            vmem_limit_bytes=vmem_limit,
        ),
    )(state, action, w1s, w1a, b1, w2, b2, w3, b3)
    # (num_tiles, 1, tile_b) -> (num_tiles*tile_b, 1) is a contiguous reshape
    # (not a transpose); slice off rows that belong to the padded last tile.
    return out.reshape(num_tiles * tile_b, 1)[:batch]


def init_params(key, n_states, n_actions, hidden_units):
    """Deterministic synthetic init (stand-in for initialize_weight).

    Weights are stored (in, out), the first layer is pre-split into
    state/action halves, and hidden dims are zero-padded to a 128-lane last
    dim ONCE here (free at runtime; zero padding is semantics-preserving:
    padded h1/h2 columns are relu(0)=0 and padded w2/w3 entries are 0).
    """
    in_dim = n_states + n_actions
    h1, h2 = hidden_units
    h1p = _round_up(h1, _LANE)
    h2p = _round_up(h2, _LANE)
    k1, k2, k3 = jax.random.split(key, 3)

    def glorot(k, fan_in, fan_out):
        scale = jnp.sqrt(2.0 / (fan_in + fan_out))
        return jax.random.normal(k, (fan_in, fan_out), dtype=jnp.float32) * scale

    w1 = glorot(k1, in_dim, h1)                       # (in_dim, h1)
    w2 = glorot(k2, h1, h2)                           # (h1, h2)
    w3 = glorot(k3, h2, 1)                            # (h2, 1)

    # split + pad once at init -- no per-call padding ops
    w1s = jnp.zeros((n_states, h1p), jnp.float32).at[:, :h1].set(w1[:n_states])
    w1a = jnp.zeros((n_actions, h1p), jnp.float32).at[:, :h1].set(w1[n_states:])
    b1 = jnp.zeros((1, h1p), jnp.float32)
    w2p = jnp.zeros((h1p, h2p), jnp.float32).at[:h1, :h2].set(w2)
    b2 = jnp.zeros((1, h2p), jnp.float32)
    w3row = jnp.zeros((1, h2p), jnp.float32).at[0, :h2].set(w3[:, 0])
    b3 = jnp.zeros((1, 1), jnp.float32)
    return (w1s, w1a, b1, w2p, b2, w3row, b3)


def reference_forward(state, action, params, n_states, hidden_units):
    """Pure-JAX reference with the ORIGINAL (unpadded, concat-based) semantics."""
    w1s, w1a, b1, w2, b2, w3, b3 = params
    h1u, h2u = hidden_units
    w1 = jnp.concatenate((w1s[:, :h1u], w1a[:, :h1u]), axis=0)   # (in_dim, h1)
    x = jnp.concatenate((state, action), axis=-1)
    h1 = jnp.maximum(x @ w1 + b1[:, :h1u], 0.0)
    h2 = jnp.maximum(h1 @ w2[:h1u, :h2u] + b2[:, :h2u], 0.0)
    return h2 @ w3[:, :h2u].T + b3


if __name__ == "__main__":
    # Small shapes consistent with the module's forward:
    #   state: (B, n_states), action: (B, n_actions), hidden_units_mlp = (32, 32)
    B, n_states, n_actions = 8, 12, 4
    hidden_units = (32, 32)

    key = jax.random.PRNGKey(0)
    k_s, k_a, k_p = jax.random.split(key, 3)
    state = jax.random.normal(k_s, (B, n_states), dtype=jnp.float32)
    action = jax.random.normal(k_a, (B, n_actions), dtype=jnp.float32)
    params = init_params(k_p, n_states, n_actions, hidden_units)

    q = critic_q_forward(state, action, params)
    q = jax.block_until_ready(q)

    q_ref = reference_forward(state, action, params, n_states, hidden_units)
    assert q.shape == (B, 1), q.shape
    assert jnp.allclose(q, q_ref, atol=1e-5, rtol=1e-5), (q, q_ref)

    # Also exercise the tiled (grid) path: non-divisor batch -> even grid,
    # partial last tile, lane-dense per-tile output rows.
    B2 = 2500
    k_s2, k_a2 = jax.random.split(jax.random.PRNGKey(1), 2)
    state2 = jax.random.normal(k_s2, (B2, n_states), dtype=jnp.float32)
    action2 = jax.random.normal(k_a2, (B2, n_actions), dtype=jnp.float32)
    q2 = jax.block_until_ready(critic_q_forward(state2, action2, params))
    q2_ref = reference_forward(state2, action2, params, n_states, hidden_units)
    assert q2.shape == (B2, 1), q2.shape
    assert jnp.allclose(q2, q2_ref, atol=1e-4, rtol=1e-4), "grid-path mismatch"

    print("KERNEL_OK")
</pallas_src>

<mosaic_0001>
module attributes {stable_mosaic.version = 11 : i64} {
  func.func @_mlp_q_kernel(%arg0: memref<8x12xf32, #tpu.memory_space<vmem>>, %arg1: memref<8x4xf32, #tpu.memory_space<vmem>>, %arg2: memref<12x128xf32, #tpu.memory_space<vmem>>, %arg3: memref<4x128xf32, #tpu.memory_space<vmem>>, %arg4: memref<1x128xf32, #tpu.memory_space<vmem>>, %arg5: memref<128x128xf32, #tpu.memory_space<vmem>>, %arg6: memref<1x128xf32, #tpu.memory_space<vmem>>, %arg7: memref<1x128xf32, #tpu.memory_space<vmem>>, %arg8: memref<1x1xf32, #tpu.memory_space<smem>>, %arg9: memref<1x8xf32, #tpu.memory_space<vmem>>) attributes {dimension_semantics = [], scalar_prefetch = 0 : i64, scratch_operands = 0 : i64, tpu.core_type = #tpu.core_type<tc>} {
    %c0 = arith.constant 0 : index
    %c0_0 = arith.constant 0 : index
    %0 = vector.load %arg0[%c0, %c0_0] : memref<8x12xf32, #tpu.memory_space<vmem>>, vector<8x12xf32>
    %c0_1 = arith.constant 0 : index
    %c0_2 = arith.constant 0 : index
    %1 = vector.load %arg2[%c0_1, %c0_2] : memref<12x128xf32, #tpu.memory_space<vmem>>, vector<12x128xf32>
    %cst = arith.constant dense<0.000000e+00> : vector<8x128xf32>
    %2 = tpu.matmul %0, %1, %cst {dimension_numbers = #tpu.dot_dimension_numbers<[1], [0], [0], [1], [0, 0, 1, 1], [], []>} : vector<8x12xf32>, vector<12x128xf32>, vector<8x128xf32> -> vector<8x128xf32>
    %c0_3 = arith.constant 0 : index
    %c0_4 = arith.constant 0 : index
    %3 = vector.load %arg1[%c0_3, %c0_4] : memref<8x4xf32, #tpu.memory_space<vmem>>, vector<8x4xf32>
    %c0_5 = arith.constant 0 : index
    %c0_6 = arith.constant 0 : index
    %4 = vector.load %arg3[%c0_5, %c0_6] : memref<4x128xf32, #tpu.memory_space<vmem>>, vector<4x128xf32>
    %cst_7 = arith.constant dense<0.000000e+00> : vector<8x128xf32>
    %5 = tpu.matmul %3, %4, %cst_7 {dimension_numbers = #tpu.dot_dimension_numbers<[1], [0], [0], [1], [0, 0, 1, 1], [], []>} : vector<8x4xf32>, vector<4x128xf32>, vector<8x128xf32> -> vector<8x128xf32>
    %6 = arith.addf %2, %5 : vector<8x128xf32>
    %c0_8 = arith.constant 0 : index
    %c0_9 = arith.constant 0 : index
    %7 = vector.load %arg4[%c0_8, %c0_9] : memref<1x128xf32, #tpu.memory_space<vmem>>, vector<1x128xf32>
    %8 = vector.broadcast %7 : vector<1x128xf32> to vector<8x128xf32>
    %9 = arith.addf %6, %8 : vector<8x128xf32>
    %cst_10 = arith.constant 0.000000e+00 : f32
    %10 = vector.broadcast %cst_10 : f32 to vector<8x128xf32>
    %11 = arith.maximumf %9, %10 : vector<8x128xf32>
    %c0_11 = arith.constant 0 : index
    %c0_12 = arith.constant 0 : index
    %12 = vector.load %arg5[%c0_11, %c0_12] : memref<128x128xf32, #tpu.memory_space<vmem>>, vector<128x128xf32>
    %cst_13 = arith.constant dense<0.000000e+00> : vector<8x128xf32>
    %13 = tpu.matmul %11, %12, %cst_13 {dimension_numbers = #tpu.dot_dimension_numbers<[1], [0], [0], [1], [0, 0, 1, 1], [], []>} : vector<8x128xf32>, vector<128x128xf32>, vector<8x128xf32> -> vector<8x128xf32>
    %c0_14 = arith.constant 0 : index
    %c0_15 = arith.constant 0 : index
    %14 = vector.load %arg6[%c0_14, %c0_15] : memref<1x128xf32, #tpu.memory_space<vmem>>, vector<1x128xf32>
    %15 = vector.broadcast %14 : vector<1x128xf32> to vector<8x128xf32>
    %16 = arith.addf %13, %15 : vector<8x128xf32>
    %cst_16 = arith.constant 0.000000e+00 : f32
    %17 = vector.broadcast %cst_16 : f32 to vector<8x128xf32>
    %18 = arith.maximumf %16, %17 : vector<8x128xf32>
    %c0_17 = arith.constant 0 : index
    %c0_18 = arith.constant 0 : index
    %19 = vector.load %arg7[%c0_17, %c0_18] : memref<1x128xf32, #tpu.memory_space<vmem>>, vector<1x128xf32>
    %cst_19 = arith.constant dense<0.000000e+00> : vector<1x8xf32>
    %20 = tpu.matmul %19, %18, %cst_19 {dimension_numbers = #tpu.dot_dimension_numbers<[1], [1], [0], [0], [0, 0, 1, 0], [], []>} : vector<1x128xf32>, vector<8x128xf32>, vector<1x8xf32> -> vector<1x8xf32>
    %c0_20 = arith.constant 0 : index
    %c0_21 = arith.constant 0 : index
    %21 = memref.load %arg8[%c0_20, %c0_21] : memref<1x1xf32, #tpu.memory_space<smem>>
    %22 = vector.broadcast %21 : f32 to vector<1x8xf32>
    %23 = arith.addf %20, %22 : vector<1x8xf32>
    %c0_22 = arith.constant 0 : index
    %c0_23 = arith.constant 0 : index
    %24 = vector.load %arg9[%c0_22, %c0_23] : memref<1x8xf32, #tpu.memory_space<vmem>>, vector<1x8xf32>
    tpu.vector_store %arg9[%c0_22, %c0_23], %23 {strides = array<i32>} : memref<1x8xf32, #tpu.memory_space<vmem>>, vector<1x8xf32>,
    return
  }
}

</mosaic_0001>

<bundles_post_ra>
// kernel: critic_q_forward.1
= control target key start
LH: loop header
LB: loop body
LE: loop exit
PB: predicated region body
PF: predicated region fallthrough
CT: control target
= control target key end

     0   :  { %15 = vsyncpa [#allocation4], 0  ;;  %s390_s0 = inlined_call_operand.vmem [shape: f32[8,12], index: 0, kind: input, shape index: {}]   ;;  %s391_s1 = inlined_call_operand.vmem [shape: f32[8,4], index: 1, kind: input, shape index: {}]   ;;  %s392_s2 = inlined_call_operand.hbm [shape: f32[12,128], index: 2, kind: input, shape index: {}]   ;;  %s393_s3 = inlined_call_operand.vmem [shape: f32[4,128], index: 3, kind: input, shape index: {}]   ;;  %s394_s4 = inlined_call_operand.vmem [shape: f32[1,128], index: 4, kind: input, shape index: {}]   ;;  %s395_s5 = inlined_call_operand.hbm [shape: f32[128,128], index: 5, kind: input, shape index: {}]   ;;  %s396_s6 = inlined_call_operand.vmem [shape: f32[1,128], index: 6, kind: input, shape index: {}]   ;;  %s397_s7 = inlined_call_operand.vmem [shape: f32[1,128], index: 7, kind: input, shape index: {}]   ;;  %s398_s8 = inlined_call_operand.<no memory space> [shape: f32[1,1], index: 8, kind: input, shape index: {}]   ;;  %s399_s9 = inlined_call_operand.hbm [shape: f32[1,8], index: 9, kind: output, shape index: {}]  }
   0x1   :  { %16 = vsyncpa [#allocation7], 0 }
   0x2   :  { %17 = vsyncpa [#allocation5], 0  ;;  %s26_s11 = sshll.u32 %s392_s2, 4  ;;  %s305_s12 = smov [#allocation3]   ;;  %s27_s11 = int_to_ptr.hbm [resolvable:$true] %s26_s11 }
   0x3   :  { %s28_s13 = sshll.u32 %s305_s12, 4  ;;  %s43_s16 = sshll.u32 %s395_s5, 4  ;;  %s29_s13 = int_to_ptr.vmem [resolvable:$true] %s28_s13  ;;  %s44_s16 = int_to_ptr.hbm [resolvable:$true] %s43_s16 }
   0x4   :  { %s306_s17 = smov 128   ;;  %s307_s18 = smov 8  }
   0x5   :  { %34 = dma.hbm_to_vmem [thread:$0]  %s27_s11, 256, %s29_s13, [#allocation4], %s306_s17, %s306_s17, %s307_s18  }
   0x6   :  { %s308_s19 = smov [#allocation6]  }
   0x7   :  { %s45_s20 = sshll.u32 %s308_s19, 4  ;;  %s46_s20 = int_to_ptr.vmem [resolvable:$true] %s45_s20 }
   0x8   :  { %51 = dma.hbm_to_vmem [thread:$0]  %s44_s16, 2048, %s46_s20, [#allocation7], %s306_s17, %s306_s17, %s307_s18  }
   0x9   :  { %299 = dma.done.wait [#allocation4], 256  }
   0xa   :  { %300 = vsyncadd [#allocation4], 4294967040 }
   0xb   :  { %301 = dma.done.wait [#allocation7], 2048  }
   0xc   :  { %302 = vsyncadd [#allocation7], 4294965248  ;;  %vm75_vm0 = vcmask 1043456   ;;  %vm71_vm1 = vcmask 31744   ;;  %v68_v0 = vld [vmem:[#allocation3 + $0x8] sm:$0xf]  ;;  %v175_v32 = vstv %s398_s8 }
   0xd   :  { %v70_v1 = vld [vmem:[%s393_s3] sm:$0xf]  ;;  %218 = vmatpush.msk.msra.mxu1 %vm75_vm0, %v68_v0  ;;  %vm99_vm2 = vcmask 97280   ;;  %v147_v5 = vld [vmem:[#allocation6 + $0x78] sm:$0xff]  ;;  %v145_v7 = vld [vmem:[#allocation6 + $0x68] sm:$0xff]  ;;  %s309_s29 = smov [#allocation8]  }
   0xe   :  { %v67_v2 = vld [vmem:[#allocation3] sm:$0xff]  ;;  %216 = vmatpush.msk.msra.mxu0 %vm75_vm0, %v70_v1  ;;  %152 = vmatpush.msra.mxu2 %v147_v5  ;;  %v144_v8 = vld [vmem:[#allocation6 + $0x60] sm:$0xff]  ;;  %v143_v9 = vld [vmem:[#allocation6 + $0x58] sm:$0xff]  ;;  %s203_s30 = sshll.u32 %s309_s29, 4  ;;  %s205_s12 = sshll.u32 %s399_s9, 4  ;;  %vm196_vm3 = vcmask 57344   ;;  %s204_s30 = int_to_ptr.vmem [resolvable:$true] %s203_s30  ;;  %s206_s12 = int_to_ptr.hbm [resolvable:$true] %s205_s12 }
   0xf   :  { %v69_v3 = vld [vmem:[%s391_s1] sm:$0xff]  ;;  %121 = vmatpush.msra.mxu1 %v67_v2  ;;  %v141_v11 = vld [vmem:[#allocation6 + $0x48] sm:$0xff]  ;;  %v140_v12 = vld [vmem:[#allocation6 + $0x40] sm:$0xff] }
  0x10   :  { %v66_v4 = vld [vmem:[%s390_s0] sm:$0xff]  ;;  %217 = vmatmul.msk.f32.vlgmr.msra.gmra.mxu0 %vm71_vm1, %v69_v3  ;;  %v139_v13 = vld [vmem:[#allocation6 + $0x38] sm:$0xff]  ;;  %v137_v15 = vld [vmem:[#allocation6 + $0x28] sm:$0xff] }
  0x11   :  { %v146_v6 = vld [vmem:[#allocation6 + $0x70] sm:$0xff]  ;;  %219 = vmatmul.msk.f32.vlgmr.msra.gmra.mxu1 %vm99_vm2, %v66_v4  ;;  %v136_v16 = vld [vmem:[#allocation6 + $0x20] sm:$0xff]  ;;  %v135_v17 = vld [vmem:[#allocation6 + $0x18] sm:$0xff] }
  0x12   :  { %153 = vmatpush.msra.mxu2 %v146_v6  ;;  %v142_v10 = vld [vmem:[#allocation6 + $0x50] sm:$0xff]  ;;  %v133_v19 = vld [vmem:[#allocation6 + $0x8] sm:$0xff]  ;;  %v132_v20 = vld [vmem:[#allocation6] sm:$0xff] }
  0x13   :  { %v138_v14 = vld [vmem:[#allocation6 + $0x30] sm:$0xff] }
  0x14   :  { %154 = vmatpush.msra.mxu2 %v145_v7  ;;  %v134_v18 = vld [vmem:[#allocation6 + $0x10] sm:$0xff] }
  0x15   :  { %v225_v22 = vld [vmem:[%s394_s4] ss:$0 sm:$0xff] }
  0x16   :  { %155 = vmatpush.msra.mxu2 %v144_v8  ;;  %v226_v27 = vld [vmem:[%s396_s6] ss:$0 sm:$0xff] }
  0x17   :  { %v173_v31 = vld [vmem:[%s397_s7] sm:$0x1] }
  0x18   :  { %156 = vmatpush.msra.mxu2 %v143_v9 }
  0x1a   :  { %157 = vmatpush.msra.mxu2 %v142_v10 }
  0x1c   :  { %158 = vmatpush.msra.mxu2 %v141_v11 }
  0x1e   :  { %159 = vmatpush.msra.mxu2 %v140_v12 }
  0x20   :  { %160 = vmatpush.msra.mxu2 %v139_v13 }
  0x22   :  { %161 = vmatpush.msra.mxu2 %v138_v14 }
  0x24   :  { %162 = vmatpush.msra.mxu2 %v137_v15 }
  0x26   :  { %163 = vmatpush.msra.mxu2 %v136_v16 }
  0x28   :  { %164 = vmatpush.msra.mxu2 %v135_v17 }
  0x2a   :  { %165 = vmatpush.msra.mxu2 %v134_v18 }
  0x2c   :  { %166 = vmatpush.msra.mxu2 %v133_v19 }
  0x2e   :  { %167 = vmatpush.msra.mxu2 %v132_v20 }
  0x8d   :  { %v96_v21 = vpop.f32.mrf.mxu0 }
  0x8e   :  { %v123_v23 = vpop.f32.mrf.mxu1 }
  0x8f   :  { %v124_v24 = vadd.f32 %v123_v23, %v96_v21 }
  0x91   :  { %v130_v25 = vadd.f32 %v225_v22, %v124_v24 }
  0x93   :  { %v131_v26 = vmax.f32 %v130_v25, 0.0 }
  0x95   :  { %168 = vmatmul.f32.vlgmr.msra.gmra.mxu2 %v131_v26 }
 0x118   :  { %v169_v28 = vpop.f32.mrf.mxu2 }
 0x119   :  { %v170_v29 = vadd.f32 %v226_v27, %v169_v28 }
 0x11b   :  { %v172_v30 = vmax.f32 %v170_v29, 0.0 }
 0x11d   :  { %191 = vmatpush.xpose.msra.mxu3 %v172_v30 }
 0x120   :  { %192 = vmatmul.f32.vlgmr.msra.gmra.mxu3 %v173_v31 }
 0x1a3   :  { %v193_v33 = vpop.f32.mrf.mxu3 }
 0x1a4   :  { %v194_v34 = vadd.f32 %v193_v33, %v175_v32 }
 0x1a6   :  { %197 = vst.msk [vmem:[#allocation8] sm:$0x1] %vm196_vm3, %v194_v34 }
 0x1a7   :  { %208 = dma.vmem_to_hbm [thread:$0]  %s204_s30, 16, %s206_s12, [#allocation5]  }
 0x1a8   :  { %303 = dma.done.wait [#allocation5], 16  }
 0x1a9   :  { %304 = vsyncadd [#allocation5], 4294967280 }
 0x1aa   :  { %213 = vsyncpa [#allocation4], 1 }
 0x1ab   :  { %214 = vsyncpa [#allocation7], 1 }
 0x1ac   :  { %215 = vsyncpa [#allocation5], 1 }

</bundles_post_ra>
